<compile_context>
chip_gen: v7x
topology: tpu7x:2x2x1
jax: 0.10.0
libtpu: 0.0.40
codegen_flags: <defaults>
</compile_context>

<pallas_src>
import jax
import jax.numpy as jnp
from jax.experimental import pallas as pl
from jax.experimental.pallas import tpu as pltpu


def _patch_embed_kernel(x_ref, w_ref, b_ref, o_ref):
    # x_ref: (tm, K) bf16 flattened patches
    # w_ref: (K, tn) bf16 projection weight slice (resident: tn == N)
    # b_ref: (1, tn) f32 bias slice
    # o_ref: (tm, tn) output tile
    acc = jnp.dot(x_ref[...], w_ref[...], preferred_element_type=jnp.float32)
    o_ref[...] = (acc + b_ref[...]).astype(o_ref.dtype)


def _pick_tile(dim, max_tile, align):
    """Largest tile <= max_tile satisfying the (8,128) BlockSpec rule.

    Returns the full dim if it fits, else prefers an aligned divisor of `dim`
    (no masked edge blocks), else falls back to an aligned max tile and lets
    Pallas mask the partial edge block.
    """
    if dim <= max_tile:
        return dim
    best = max_tile - (max_tile % align)
    cand = best
    while cand >= max(align, max_tile // 2):
        if dim % cand == 0:
            return cand
        cand -= align
    return best


def patch_embedding(x, weight, bias, patch_size, *, compute_dtype=jnp.bfloat16,
                    out_dtype=None, tm=None):
    """x: (B, C, H, W) NCHW; weight: (embed_dim, C, P, P); bias: (embed_dim,).

    Returns (B, num_patches, embed_dim) in `out_dtype` (default: x.dtype).
    MXU runs in `compute_dtype` (bf16) with f32 accumulation.
    """
    B, C, H, W = x.shape
    P = patch_size
    E = weight.shape[0]
    assert H % P == 0 and W % P == 0, "spatial dims must be divisible by patch_size"
    hp, wp = H // P, W // P
    num_patches = hp * wp
    out_dtype = x.dtype if out_dtype is None else out_dtype
    out_bytes = jnp.dtype(out_dtype).itemsize

    # --- layout glue (plain JAX, fused by XLA into one bf16 copy) ---------
    # (B, C, hp, P, wp, P) -> (B, hp, wp, C, P, P) -> (B*num_patches, C*P*P)
    xp = x.astype(compute_dtype).reshape(B, C, hp, P, wp, P)
    xp = jnp.transpose(xp, (0, 2, 4, 1, 3, 5))
    xp = xp.reshape(B * num_patches, C * P * P)

    # Conv2d weight (E, C, P, P) -> (C*P*P, E) in matching (c, ph, pw) K-order.
    w2d = weight.reshape(E, C * P * P).T.astype(compute_dtype)
    b2d = bias.astype(jnp.float32).reshape(1, E)

    M, K = xp.shape
    N = E
    cbytes = jnp.dtype(compute_dtype).itemsize

    # M tile: big (amortizes ~0.35us/step), multiple of 16 (bf16 sublanes).
    if tm is None:
        tm = _pick_tile(M, 1024, 16)

    # Weight residency: keep the whole (K, N) weight in VMEM and iterate 1-D
    # over M so it (and the bias) is DMA'd exactly once.
    weight_bytes = K * N * cbytes
    weight_resident = 2 * weight_bytes <= (16 << 20)

    if weight_resident:
        tn = N
        grid = (pl.cdiv(M, tm),)
        in_specs = [
            pl.BlockSpec((tm, K), lambda i: (i, 0)),   # patches: full K per tile
            pl.BlockSpec((K, N), lambda i: (0, 0)),    # weight: constant -> fetched once
            pl.BlockSpec((1, N), lambda i: (0, 0)),    # bias: constant -> fetched once
        ]
        out_specs = pl.BlockSpec((tm, N), lambda i: (i, 0))
        dim_sem = ("parallel",)
        weight_traffic = weight_bytes
    else:
        # Rare fallback for huge K*N: tile N too (prefer 256-multiples, v6e MXU).
        tn = _pick_tile(N, 512, 256 if N % 256 == 0 else 128)
        grid = (pl.cdiv(M, tm), pl.cdiv(N, tn))
        in_specs = [
            pl.BlockSpec((tm, K), lambda i, j: (i, 0)),
            pl.BlockSpec((K, tn), lambda i, j: (0, j)),
            pl.BlockSpec((1, tn), lambda i, j: (0, j)),
        ]
        out_specs = pl.BlockSpec((tm, tn), lambda i, j: (i, j))
        dim_sem = ("parallel", "parallel")
        weight_traffic = pl.cdiv(M, tm) * weight_bytes

    # Scoped VMEM: double-buffered x/out tiles + weight + bias, with headroom.
    # Set explicitly so v5e's 16 MiB default does not reject the larger tiles.
    per_step = (2 * (tm * K * cbytes + tm * tn * out_bytes)
                + 2 * (K * tn * cbytes) + 2 * tn * 4)
    vmem_limit = int(min(max(per_step * 3 // 2, 32 << 20), 56 << 20))

    cost = pl.CostEstimate(
        flops=2 * M * K * N,
        transcendentals=0,
        bytes_accessed=M * K * cbytes + weight_traffic + N * 4 + M * N * out_bytes,
    )

    out = pl.pallas_call(
        _patch_embed_kernel,
        out_shape=jax.ShapeDtypeStruct((M, N), out_dtype),
        grid_spec=pltpu.PrefetchScalarGridSpec(
            num_scalar_prefetch=0,
            grid=grid,
            in_specs=in_specs,
            out_specs=out_specs,
        ),
        compiler_params=pltpu.CompilerParams(
            dimension_semantics=dim_sem,
            vmem_limit_bytes=vmem_limit,
        ),
        cost_estimate=cost,
    )(xp, w2d, b2d)

    return out.reshape(B, num_patches, E)


def _reference(x, weight, bias, P):
    E = weight.shape[0]
    ref = jax.lax.conv_general_dilated(
        x, weight, window_strides=(P, P), padding="VALID",
        dimension_numbers=("NCHW", "OIHW", "NCHW"),
    ) + bias.reshape(1, E, 1, 1)
    B = x.shape[0]
    return ref.reshape(B, E, -1).transpose(0, 2, 1)


if __name__ == "__main__":
    key = jax.random.PRNGKey(0)

    # --- Test 1: small shapes consistent with the module -------------------
    # img_size=16, patch_size=4, in_chans=4, embed_dim=32 -> num_patches=16.
    B, C, H, W = 2, 4, 16, 16
    P, E = 4, 32
    k1, k2, k3, k4, k5, k6 = jax.random.split(key, 6)
    x = jax.random.normal(k1, (B, C, H, W), dtype=jnp.float32)
    weight = jax.random.normal(k2, (E, C, P, P), dtype=jnp.float32) * 0.02
    bias = jax.random.normal(k3, (E,), dtype=jnp.float32) * 0.02

    fn = jax.jit(lambda xx, ww, bb: patch_embedding(xx, ww, bb, P))
    out = jax.block_until_ready(fn(x, weight, bias))
    ref = _reference(x, weight, bias, P)
    assert out.shape == (B, (H // P) * (W // P), E), out.shape
    # MXU runs bf16 (f32 accumulate) -> bf16-level tolerance.
    assert jnp.allclose(out, ref, atol=2e-2, rtol=2e-2), float(jnp.max(jnp.abs(out - ref)))

    # --- Test 2: non-divisible M (masked edge block) + bf16 output ---------
    # 20x20 image, P=4 -> 5x5=25 patches; force tm=16 so grid_M=2 with a
    # partial edge block; E=48 exercises a non-128-multiple (full-dim) N.
    B2, C2, H2, W2, P2, E2 = 1, 3, 20, 20, 4, 48
    x2 = jax.random.normal(k4, (B2, C2, H2, W2), dtype=jnp.float32)
    w2 = jax.random.normal(k5, (E2, C2, P2, P2), dtype=jnp.float32) * 0.02
    b2 = jax.random.normal(k6, (E2,), dtype=jnp.float32) * 0.02

    fn2 = jax.jit(lambda xx, ww, bb: patch_embedding(
        xx, ww, bb, P2, out_dtype=jnp.bfloat16, tm=16))
    out2 = jax.block_until_ready(fn2(x2, w2, b2))
    ref2 = _reference(x2, w2, b2, P2)
    assert out2.shape == (B2, 25, E2), out2.shape
    assert jnp.allclose(out2.astype(jnp.float32), ref2, atol=3e-2, rtol=3e-2), \
        float(jnp.max(jnp.abs(out2.astype(jnp.float32) - ref2)))

    print("KERNEL_OK")
</pallas_src>

<mosaic_0001>
module attributes {stable_mosaic.version = 11 : i64} {
  func.func @_patch_embed_kernel(%arg0: i32, %arg1: memref<32x64xbf16, #tpu.memory_space<vmem>>, %arg2: memref<64x32xbf16, #tpu.memory_space<vmem>>, %arg3: memref<1x32xf32, #tpu.memory_space<vmem>>, %arg4: memref<32x32xf32, #tpu.memory_space<vmem>>) attributes {dimension_semantics = [#tpu.dimension_semantics<parallel>], iteration_bounds = array<i64: 1>, scalar_prefetch = 0 : i64, scratch_operands = 0 : i64, tpu.core_type = #tpu.core_type<tc>, window_params = [{transform_indices = @transform_0, window_bounds = array<i64: 32, 64>}, {pipeline_mode = #tpu.pipeline_mode<synchronous>, transform_indices = @transform_1, window_bounds = array<i64: 64, 32>}, {pipeline_mode = #tpu.pipeline_mode<synchronous>, transform_indices = @transform_2, window_bounds = array<i64: 1, 32>}, {transform_indices = @transform_3, window_bounds = array<i64: 32, 32>}]} {
    %c0 = arith.constant 0 : index
    %c0_0 = arith.constant 0 : index
    %0 = vector.load %arg1[%c0, %c0_0] : memref<32x64xbf16, #tpu.memory_space<vmem>>, vector<32x64xbf16>
    %c0_1 = arith.constant 0 : index
    %c0_2 = arith.constant 0 : index
    %1 = vector.load %arg2[%c0_1, %c0_2] : memref<64x32xbf16, #tpu.memory_space<vmem>>, vector<64x32xbf16>
    %cst = arith.constant dense<0.000000e+00> : vector<32x32xf32>
    %2 = tpu.matmul %0, %1, %cst {dimension_numbers = #tpu.dot_dimension_numbers<[1], [0], [0], [1], [0, 0, 1, 1], [], []>} : vector<32x64xbf16>, vector<64x32xbf16>, vector<32x32xf32> -> vector<32x32xf32>
    %c0_3 = arith.constant 0 : index
    %c0_4 = arith.constant 0 : index
    %3 = vector.load %arg3[%c0_3, %c0_4] : memref<1x32xf32, #tpu.memory_space<vmem>>, vector<1x32xf32>
    %4 = vector.broadcast %3 : vector<1x32xf32> to vector<32x32xf32>
    %5 = arith.addf %2, %4 : vector<32x32xf32>
    %c0_5 = arith.constant 0 : index
    %c0_6 = arith.constant 0 : index
    %6 = vector.load %arg4[%c0_5, %c0_6] : memref<32x32xf32, #tpu.memory_space<vmem>>, vector<32x32xf32>
    tpu.vector_store %arg4[%c0_5, %c0_6], %5 {strides = array<i32>} : memref<32x32xf32, #tpu.memory_space<vmem>>, vector<32x32xf32>,
    return
  }
  func.func @transform_0(%arg0: i32) -> (i32, i32) {
    %c0_i32 = arith.constant 0 : i32
    %c0_i32_0 = arith.constant 0 : i32
    return %arg0, %c0_i32 : i32, i32
  }
  func.func @transform_1(%arg0: i32) -> (i32, i32) {
    %c0_i32 = arith.constant 0 : i32
    %c0_i32_0 = arith.constant 0 : i32
    %c0_i32_1 = arith.constant 0 : i32
    return %c0_i32, %c0_i32_0 : i32, i32
  }
  func.func @transform_2(%arg0: i32) -> (i32, i32) {
    %c0_i32 = arith.constant 0 : i32
    %c0_i32_0 = arith.constant 0 : i32
    %c0_i32_1 = arith.constant 0 : i32
    return %c0_i32, %c0_i32_0 : i32, i32
  }
  func.func @transform_3(%arg0: i32) -> (i32, i32) {
    %c0_i32 = arith.constant 0 : i32
    %c0_i32_0 = arith.constant 0 : i32
    return %arg0, %c0_i32 : i32, i32
  }
}

</mosaic_0001>

<bundles_post_ra>
// kernel: _lambda_.1
= control target key start
LH: loop header
LB: loop body
LE: loop exit
PB: predicated region body
PF: predicated region fallthrough
CT: control target
= control target key end

     0   :  { %vm69_vm0 = vcmask 523264   ;;  %s262_s0 = inlined_call_operand.vmem [shape: bf16[32,64], index: 0, kind: input, shape index: {}]   ;;  %s263_s1 = inlined_call_operand.vmem [shape: bf16[64,32], index: 1, kind: input, shape index: {}]   ;;  %s264_s2 = inlined_call_operand.vmem [shape: f32[1,32], index: 2, kind: input, shape index: {}]   ;;  %s265_s3 = inlined_call_operand.hbm [shape: f32[32,32], index: 3, kind: output, shape index: {}]  }
   0x1   :  { %v176_v0 = vld [vmem:[%s263_s1] sm:$0xff]   ;;  %v177_v1 = vld [vmem:[%s263_s1 + $0x8] sm:$0xff]   ;;  %v178_v2 = vld [vmem:[%s263_s1 + $0x10] sm:$0xff]  }
   0x2   :  { %161 = vmatprep.subr.bf16.mxu0 %v176_v0  ;;  %v180_v3 = vld [vmem:[%s262_s0] sm:$0xff]  }
   0x3   :  { %162 = vmatpush3.bf16.msra.mxu0 %v176_v0  ;;  %169 = vmatprep.mubr.msk.bf16.mxu0 %vm69_vm0, %v180_v3 }
   0x4   :  { %163 = vmatprep.subr.bf16.mxu0 %v177_v1 }
   0x5   :  { %8 = vsyncpa [#allocation3], 0  ;;  %v179_v4 = vld [vmem:[%s263_s1 + $0x18] sm:$0xff]   ;;  %v181_v5 = vld [vmem:[%s262_s0 + $0x8] sm:$0xff]   ;;  %vm125_vm1 = vcmask 261120   ;;  %s206_s26 = smov [#allocation2]  }
   0x6   :  { %v146_v6 = vld [vmem:[%s264_s2] ss:$0 sm:$0xff]  ;;  %s135_s27 = sshll.u32 %s206_s26, 4  ;;  %s136_s27 = int_to_ptr.vmem [resolvable:$true] %s135_s27 }
   0x7   :  { %164 = vmatpush3.bf16.msra.mxu0 %v177_v1  ;;  %s182_s0 = scalar_lea.vmem %s136_s27, 512  ;;  %p187_p1 = scmp.lt.s32.totalorder %s136_s27, %s136_s27 }
   0x8   :  { %165 = vmatprep.subr.bf16.mxu0 %v178_v2  ;;  %p183_p0 = scmp.ne.s32.totalorder %s136_s27, %s182_s0  ;;  %p188_p2 = scmp.lt.s32.totalorder %s182_s0, %s182_s0 }
   0xa   :  { %p189_p3 = por %p188_p2, %p187_p1 }
   0xb   :  { %166 = vmatpush3.bf16.msra.mxu0 %v178_v2 }
   0xc   :  { %167 = vmatprep.subr.bf16.mxu0 %v179_v4  ;;  %p190_p4 = pnand %p189_p3, %p183_p0 }
   0xf   :  { %168 = vmatpush3.bf16.msra.mxu0 %v179_v4 }
  0x12   :  { %170 = vmatmul.mubr.msk.bf16.vlgmr.msra.gmra.mrb[0].mxu0 %vm69_vm0, %v181_v5 }
  0xe5   :  { %v171_v7 = vpop.f32.mrb[0].mxu0 }
  0xe6   :  { %v119_v8 = vadd.f32 %v171_v7, %v146_v6  ;;  %v110_v9 = vpop.f32.mrb[1].mxu0 }
  0xe7   :  { %v111_v10 = vadd.f32 %v146_v6, %v110_v9  ;;  %v172_v11 = vpop.f32.mrb[2].mxu0 }
  0xe8   :  { %128 = vst.msk [vmem:[#allocation2 + $0x10] sm:$0xff] %vm125_vm1, %v119_v8  ;;  %v122_v12 = vadd.f32 %v172_v11, %v146_v6  ;;  %v113_v13 = vpop.f32.mrb[3].mxu0 }
  0xe9   :  { %126 = vst.msk [vmem:[#allocation2] sm:$0xff] %vm125_vm1, %v111_v10  ;;  %v114_v14 = vadd.f32 %v146_v6, %v113_v13 }
  0xea   :  { %129 = vst.msk [vmem:[#allocation2 + $0x18] sm:$0xff] %vm125_vm1, %v122_v12 }
  0xeb   :  { %127 = vst.msk [vmem:[#allocation2 + $0x8] sm:$0xff] %vm125_vm1, %v114_v14 }
  0xec   :  { %193 = shalt.err (!%p190_p4)
}
  0xed   :  { %s194_s28 = scalar_lea.hbm %s265_s3, 512 }
  0xee   :  { %p195_p5 = scmp.ne.s32.totalorder %s265_s3, %s194_s28  ;;  %p198_p6 = scmp.lt.u32.totalorder %s194_s28, %s265_s3 }
  0xf0   :  { %p200_p7 = pnand %p198_p6, %p195_p5 }
  0xf2   :  { %203 = shalt.err (!%p200_p7)
}
  0xf3   :  { %s207_s6 = smov 128   ;;  %s208_s7 = smov 8  }
  0xf4   :  { %141 = dma.vmem_to_hbm [thread:$0]  %s136_s27, 512, %s265_s3, [#allocation3], %s207_s6, %s207_s6, %s208_s7  }
  0xf5   :  { %204 = dma.done.wait [#allocation3], 512  }
  0xf6   :  { %205 = vsyncadd [#allocation3], 4294966784 }
  0xf7   :  { %145 = vsyncpa [#allocation3], 1 }

</bundles_post_ra>
